<compile_context>
chip_gen: v7x
topology: tpu7x:2x2x1
jax: 0.10.0
libtpu: 0.0.40
codegen_flags: <defaults>
</compile_context>

<pallas_src>
import jax
import jax.numpy as jnp
from jax.experimental import pallas as pl
from jax.experimental.pallas import tpu as pltpu


def _conv1x1_kernel(w_ref, b_ref, x_ref, o_ref):
    # w_ref: (C_out, C_in)   b_ref: (C_out, 1)
    # x_ref: (C_in, TV)      o_ref: (C_out, TV)
    acc = jnp.dot(w_ref[...], x_ref[...], preferred_element_type=jnp.float32)
    o_ref[...] = (acc + b_ref[...]).astype(o_ref.dtype)


def output_transition(x, weight, bias, *, tile_vox=None,
                      vmem_budget_bytes=8 * 1024 * 1024):
    """1x1x1 Conv3d forward, NCDHW layout preserved end-to-end.

    x:      (N, C_in, D, H, W)   float32
    weight: (C_out, C_in)        float32  (Conv3d weight squeezed over 1x1x1)
    bias:   (C_out,)             float32
    returns (N, C_out, D, H, W)  float32
    """
    N, C_in, D, H, W = x.shape
    C_out = weight.shape[0]
    dhw = D * H * W

    # (N, C_in, D, H, W) -> (N, C_in, DHW): free reshape, no data movement.
    x3 = x.reshape(N, C_in, dhw)

    # Pad the voxel (lane) axis to 128 only if needed.  Typical VNet volumes
    # (powers of two) never hit this branch, so usually no extra HBM copy.
    pad = (-dhw) % 128
    if pad:
        x3 = jnp.pad(x3, ((0, 0), (0, 0), (0, pad)))
    dhw_p = dhw + pad

    # Voxel tile: pick the largest 128-aligned tile whose double-buffered
    # in+out footprint stays inside a conservative VMEM budget (safe on the
    # v5e 16 MiB default scoped limit, and leaves headroom on v6e/v7x).
    # Bigger tiles -> fewer grid steps -> less per-step overhead (~0.35 us/step)
    # and longer, more efficient HBM DMA bursts.
    if tile_vox is None:
        bytes_per_vox = (C_in + C_out) * 4            # f32 in + f32 out
        tile_vox = vmem_budget_bytes // (2 * bytes_per_vox)  # x2: double-buffered
    tile_vox = max(128, (tile_vox // 128) * 128)
    tv = min(tile_vox, dhw_p)
    n_tiles = pl.cdiv(dhw_p, tv)   # partial last block is masked by Pallas

    w = weight.astype(x.dtype)                       # (C_out, C_in)
    b = bias.reshape(C_out, 1).astype(jnp.float32)   # broadcasts over lanes

    # Advisory cost: bandwidth-bound op (contraction dim K = C_in is tiny).
    cost = pl.CostEstimate(
        flops=2 * N * dhw * C_in * C_out,
        transcendentals=0,
        bytes_accessed=4 * N * dhw * (C_in + C_out) + 4 * C_out * (C_in + 1),
    )

    out3 = pl.pallas_call(
        _conv1x1_kernel,
        out_shape=jax.ShapeDtypeStruct((N, C_out, dhw_p), x.dtype),
        grid_spec=pltpu.PrefetchScalarGridSpec(
            num_scalar_prefetch=0,
            grid=(N, n_tiles),
            in_specs=[
                # weight / bias: tiny blocks, same block index every step ->
                # fetched once and kept resident in VMEM.
                pl.BlockSpec((C_out, C_in), lambda n, i: (0, 0)),
                pl.BlockSpec((C_out, 1), lambda n, i: (0, 0)),
                # activation: batch dim squeezed, lane-dense voxel tile.
                pl.BlockSpec((None, C_in, tv), lambda n, i: (n, 0, i)),
            ],
            out_specs=pl.BlockSpec((None, C_out, tv), lambda n, i: (n, 0, i)),
        ),
        compiler_params=pltpu.CompilerParams(
            # Both grid axes are independent -> shard across v7x's two TCs.
            dimension_semantics=("parallel", "parallel")),
        cost_estimate=cost,
    )(w, b, x3)

    if pad:
        out3 = out3[:, :, :dhw]
    # (N, C_out, DHW) -> NCDHW: free reshape, no transpose anywhere.
    return out3.reshape(N, C_out, D, H, W)


if __name__ == "__main__":
    # Small deterministic example: batch=2, in_channels=4, n_classes=2, spatial=8^3
    N, C_in, Dd, Hh, Ww = 2, 4, 8, 8, 8
    n_classes = 2

    key = jax.random.PRNGKey(0)
    kx, kw, kb = jax.random.split(key, 3)

    x = jax.random.normal(kx, (N, C_in, Dd, Hh, Ww), dtype=jnp.float32)
    # Conv3d weight has shape (n_classes, in_channels, 1, 1, 1); store squeezed.
    weight = jax.random.normal(kw, (n_classes, C_in), dtype=jnp.float32) * 0.1
    bias = jax.random.normal(kb, (n_classes,), dtype=jnp.float32) * 0.1

    out = jax.block_until_ready(output_transition(x, weight, bias))

    # Reference check in plain JAX (1x1x1 conv == channel einsum + bias).
    ref = jnp.einsum("ncdhw,oc->nodhw", x, weight) + bias[None, :, None, None, None]
    assert out.shape == (N, n_classes, Dd, Hh, Ww)
    assert jnp.allclose(out, ref, atol=1e-5, rtol=1e-5)

    # TODO(synk): self.bn (InstanceNorm3d) is never applied in the PyTorch
    # forward, so it is intentionally not implemented.
    print("KERNEL_OK")
</pallas_src>

<mosaic_0001>
module attributes {stable_mosaic.version = 11 : i64} {
  func.func @_conv1x1_kernel(%arg0: i32, %arg1: i32, %arg2: memref<2x4xf32, #tpu.memory_space<vmem>>, %arg3: memref<2x1xf32, #tpu.memory_space<vmem>>, %arg4: memref<1x4x512xf32, #tpu.memory_space<vmem>>, %arg5: memref<1x2x512xf32, #tpu.memory_space<vmem>>) attributes {dimension_semantics = [#tpu.dimension_semantics<parallel>, #tpu.dimension_semantics<parallel>], iteration_bounds = array<i64: 2, 1>, scalar_prefetch = 0 : i64, scratch_operands = 0 : i64, tpu.core_type = #tpu.core_type<tc>, window_params = [{pipeline_mode = #tpu.pipeline_mode<synchronous>, transform_indices = @transform_0, window_bounds = array<i64: 2, 4>}, {pipeline_mode = #tpu.pipeline_mode<synchronous>, transform_indices = @transform_1, window_bounds = array<i64: 2, 1>}, {transform_indices = @transform_2, window_bounds = array<i64: 1, 4, 512>}, {transform_indices = @transform_3, window_bounds = array<i64: 1, 2, 512>}]} {
    %c0 = arith.constant 0 : index
    %c0_0 = arith.constant 0 : index
    %0 = vector.load %arg2[%c0, %c0_0] : memref<2x4xf32, #tpu.memory_space<vmem>>, vector<2x4xf32>
    %c0_1 = arith.constant 0 : index
    %c0_2 = arith.constant 0 : index
    %c0_3 = arith.constant 0 : index
    %1 = vector.load %arg4[%c0_1, %c0_2, %c0_3] : memref<1x4x512xf32, #tpu.memory_space<vmem>>, vector<1x4x512xf32>
    %2 = vector.shape_cast %1 : vector<1x4x512xf32> to vector<4x512xf32>
    %cst = arith.constant dense<0.000000e+00> : vector<2x512xf32>
    %3 = tpu.matmul %0, %2, %cst {dimension_numbers = #tpu.dot_dimension_numbers<[1], [0], [0], [1], [0, 0, 1, 1], [], []>} : vector<2x4xf32>, vector<4x512xf32>, vector<2x512xf32> -> vector<2x512xf32>
    %c0_4 = arith.constant 0 : index
    %c0_5 = arith.constant 0 : index
    %4 = vector.load %arg3[%c0_4, %c0_5] : memref<2x1xf32, #tpu.memory_space<vmem>>, vector<2x1xf32>
    %5 = vector.broadcast %4 : vector<2x1xf32> to vector<2x512xf32>
    %6 = arith.addf %3, %5 : vector<2x512xf32>
    %c0_6 = arith.constant 0 : index
    %c0_7 = arith.constant 0 : index
    %c0_8 = arith.constant 0 : index
    %7 = vector.load %arg5[%c0_6, %c0_7, %c0_8] : memref<1x2x512xf32, #tpu.memory_space<vmem>>, vector<1x2x512xf32>
    %8 = vector.shape_cast %7 : vector<1x2x512xf32> to vector<2x512xf32>
    %9 = vector.shape_cast %6 : vector<2x512xf32> to vector<1x2x512xf32>
    tpu.vector_store %arg5[%c0_6, %c0_7, %c0_8], %9 {strides = array<i32>} : memref<1x2x512xf32, #tpu.memory_space<vmem>>, vector<1x2x512xf32>,
    return
  }
  func.func @transform_0(%arg0: i32, %arg1: i32) -> (i32, i32) {
    %c0_i32 = arith.constant 0 : i32
    %c0_i32_0 = arith.constant 0 : i32
    %c0_i32_1 = arith.constant 0 : i32
    return %c0_i32, %c0_i32_0 : i32, i32
  }
  func.func @transform_1(%arg0: i32, %arg1: i32) -> (i32, i32) {
    %c0_i32 = arith.constant 0 : i32
    %c0_i32_0 = arith.constant 0 : i32
    %c0_i32_1 = arith.constant 0 : i32
    return %c0_i32, %c0_i32_0 : i32, i32
  }
  func.func @transform_2(%arg0: i32, %arg1: i32) -> (i32, i32, i32) {
    %c0_i32 = arith.constant 0 : i32
    %c0_i32_0 = arith.constant 0 : i32
    return %arg0, %c0_i32, %arg1 : i32, i32, i32
  }
  func.func @transform_3(%arg0: i32, %arg1: i32) -> (i32, i32, i32) {
    %c0_i32 = arith.constant 0 : i32
    %c0_i32_0 = arith.constant 0 : i32
    return %arg0, %c0_i32, %arg1 : i32, i32, i32
  }
}

</mosaic_0001>

<bundles_post_ra>
// kernel: tpu_custom_call.1
= control target key start
LH: loop header
LB: loop body
LE: loop exit
PB: predicated region body
PF: predicated region fallthrough
CT: control target
= control target key end

     0   :  { %8 = vsyncpa [#allocation3], 0  ;;  %s908_s0 = inlined_call_operand.vmem [shape: f32[2,4], index: 0, kind: input, shape index: {}]   ;;  %s909_s1 = inlined_call_operand.vmem [shape: f32[2,1], index: 1, kind: input, shape index: {}]   ;;  %s910_s2 = inlined_call_operand.hbm [shape: f32[2,4,512], index: 2, kind: input, shape index: {}]   ;;  %s911_s3 = inlined_call_operand.hbm [shape: f32[2,2,512], index: 3, kind: output, shape index: {}]  }
   0x1   :  { %10 = vsyncpa [#allocation3 + $0x1], 0 }
   0x2   :  { %11 = vsyncpa [#allocation4], 0 }
   0x3   :  { %13 = vsyncpa [#allocation4 + $0x1], 0  ;;  %s729_s12 = smov 0   ;;  %s731_s13 = smov 0  }
   0x4   :  { %s733_s14 = smov 0   ;;  %s735_s15 = smov 0  }
   0x5   :  { %s737_s16 = smov 0   ;;  %s739_s17 = smov 0  }
   0x6 LB: > { %s499_s18 = sadd.s32 4294967295, %s702_s17   ;;  %s500_s19 = sadd.s32 4294967294, %s702_s17   ;;  %s702_s17 = sphi %s739_s17, %s19_s17   ;;  %s698_s16 = sphi %s737_s16, %s927_s16   ;;  %s694_s15 = sphi %s735_s15, %s926_s15   ;;  %s690_s14 = sphi %s733_s14, %s925_s14   ;;  %s686_s13 = sphi %s731_s13, %s924_s13   ;;  %s682_s12 = sphi %s729_s12, %s923_s12  }
   0x7   : > { %s31_s20 = sadd.s32 1, %s698_s16  ;;  %s82_s21 = sadd.s32 1, %s690_s14 }
   0x8   : > { %p33_p0 = scmp.ge.s32.totalorder %s31_s20, 2  ;;  %p89_p1 = scmp.ne.s32.totalorder %s690_s14, %s686_s13 }
   0x9   : > { %p90_p2 = scmp.eq.s32.totalorder %s702_s17, 0  ;;  %p95_p3 = scmp.ne.s32.totalorder %s686_s13, %s682_s12 }
   0xa   : > { %s929_s20 = smov (%p33_p0, %s31_s20), 0  ;;  %p96_p5 = scmp.eq.s32.totalorder %s499_s18, 0 }
   0xb   : > { %p770_p4 = por %p90_p2, %p89_p1  ;;  %s77_s23 = ssub.s32 %s698_s16, %s929_s20 }
   0xc   : > { %p121_p6 = scmp.eq.s32.totalorder %s499_s18, 1  ;;  %p80_p7 = scmp.eq.s32.totalorder %s77_s23, 0 }
   0xd   : > { %p776_p8 = por %p96_p5, %p95_p3  ;;  %p127_p10 = scmp.eq.s32.totalorder %s500_s19, 1 }
   0xe   : > { %p780_p9 = por %p121_p6, %p89_p1  ;;  %p534_p13 = scmp.lt.s32.totalorder %s702_s17, 2 }
   0xf   : > { %s785_s26 = scalar_select %p80_p7, %s690_s14, %s82_s21  }
  0x10   : > { %s915_s25 = scalar_select %p780_p9, 1, 0 }
  0x11   : > { %p787_p11 = por %p127_p10, %p95_p3  ;;  %s153_s28 = sand.u32 1, %s690_s14  }
  0x12   : > { %s503_s29 = sshll.u32 %s153_s28, 4  ;;  %s520_s30 = sshll.u32 %s698_s16, 8 }
  0x13   : > { %s916_s27 = scalar_select %p787_p11, 1, 0 }
  0x14   : > { %s798_s6 = scalar_lea.hbm %s910_s2, %s520_s30  ;;  %s157_s7 = scalar_lea.vmem [#allocation2], %s503_s29 }
  0x15   : > { %s167_s8 = sshll.u32 %s157_s7, 4  ;;  %p804_p0 = pnand %p534_p13, %p770_p4  ;;  %s800_s8 = int_to_ptr.vmem [resolvable:$true] %s167_s8 }
  0x16   : > { %s154_s10 = scalar_lea.sflag [#allocation3], %s153_s28  ;;  %s590_s11 = scalar_lea.hbm %s798_s6, 256 }
  0x17   : > { %p591_p3 = scmp.ne.s32.totalorder %s798_s6, %s590_s11  ;;  %p592_p5 = pneg %p804_p0 }
  0x18   : > { %s595_s21 = scalar_lea.hbm %s910_s2, 512  ;;  %p596_p4 = scmp.lt.u32.totalorder %s798_s6, %s910_s2 }
  0x19   : > { %p593_p6 = pnand %p592_p5, %p591_p3  ;;  %p597_p10 = scmp.lt.u32.totalorder %s595_s21, %s590_s11 }
  0x1a   : > { %p599_p12 = scmp.lt.u32.totalorder %s590_s11, %s798_s6 }
  0x1b   : > { %p594_p7 = pneg %p593_p6  ;;  %p598_p13 = por %p597_p10, %p596_p4 }
  0x1d   : > { %p600_p1 = por %p599_p12, %p598_p13 }
  0x1f   : > { %p601_p2 = pnand %p600_p1, %p594_p7 }
  0x21   : > { %604 = shalt.err (!%p601_p2)
}
  0x22   : > { %s605_s28 = scalar_lea.vmem %s800_s8, 256  ;;  %s704_s29 = smov [#allocation2]  }
  0x23   : > { %p606_p3 = scmp.ne.s32.totalorder %s800_s8, %s605_s28  ;;  %s610_s30 = sshll.u32 %s704_s29, 4  ;;  %s611_s30 = int_to_ptr.vmem [resolvable:$false] %s610_s30 }
  0x24   : > { %s612_s4 = scalar_lea.vmem %s611_s30, 512  ;;  %p613_p9 = scmp.lt.s32.totalorder %s800_s8, %s611_s30 }
  0x25   : > { %p608_p6 = pnand %p606_p3, %p592_p5  ;;  %p614_p4 = scmp.lt.s32.totalorder %s612_s4, %s605_s28 }
  0x27   : > { %p609_p11 = pneg %p608_p6  ;;  %p615_p10 = por %p614_p4, %p613_p9 }
  0x29   : > { %p616_p12 = pnand %p615_p10, %p609_p11 }
  0x2b   : > { %619 = shalt.err (!%p616_p12)
}
  0x2c   : > { %529 = dma.hbm_to_vmem [thread:$0]  (!%p804_p0), %s798_s6, 256, %s800_s8, %s154_s10  }
  0x2d   : > { %p918_p1 = scmp.lt.s32.totalorder %s702_s17, 3  ;;  %p919_p2 = scmp.ge.s32.totalorder %s702_s17, 1 }
  0x2f   : > { %p173_p5 = pnand %p919_p2, %p918_p1 }
  0x30   : > { %s840_s5 = sand.u32 (!%p173_p5), 1, %s686_s13  }
  0x31   : > { %176 = sbr.rel (%p173_p5) target bundleno = 298 (0x12a), region = 32  ;;  %s507_s7 = sshll.u32 (!%p173_p5), %s840_s5, 4 }
  0x32   : > { %s179_s11 = scalar_lea.sflag (!%p173_p5), [#allocation3], %s840_s5  ;;  %s182_s18 = scalar_lea.vmem (!%p173_p5), [#allocation2], %s507_s7 }
  0x38   : > { %673 = dma.done.wait (%p776_p8), %s179_s11, 256  }
  0x39   : > { %675 = vsyncadd (%p776_p8), %s179_s11, 4294967040  ;;  %v705_v0 = vmov 0.0   ;;  %v706_v1 = vmov 0   ;;  %v208_v2 = vld [vmem:[%s182_s18] sm:$0xff]  ;;  %vm224_vm0 = vcmask 1043456   ;;  %v209_v3 = vld [vmem:[%s182_s18 + $0x8] sm:$0xff]  ;;  %v384_v10 = vlaneseq }
  0x3a   : > { %297 = vmatprep.mubr.f32.mxu0 %v705_v0  ;;  %368 = vmatprep.mubr.f32.mxu1 %v705_v0  ;;  %v218_v4 = vcombine.high %v208_v2, %v208_v2  ;;  %v219_v5 = vcombine.high %v209_v3, %v209_v3  ;;  %v210_v6 = vld [vmem:[%s909_s1] sm:$0x3]  ;;  %vm220_vm1 = vcmask 31744   ;;  %v707_v8 = vmov 1983009808   ;;  %s508_s24 = sshll.u32 %s840_s5, 3 }
  0x3b   : > { %587 = vset.pattern.permute.xlu0 %v706_v1  ;;  %v207_v7 = vld [vmem:[%s908_s0] sm:$0x3]  ;;  %v382_v9 = vunpack.c.l.s4 %v707_v8  ;;  %v385_v13 = vshrl.u32 %v384_v10, 7  ;;  %s521_s19 = sshll.u32 %s694_s15, 7  ;;  %s204_s21 = scalar_lea.vmem [#allocation5], %s508_s24 }
  0x3c   : > { %213 = vperm.xlu0 %587, %v210_v6   ;;  %509 = vmatprep.subr.msk.mxu0 %vm224_vm0, %v218_v4  ;;  %s415_s22 = sshll.u32 %s204_s21, 4  ;;  %s859_s29 = scalar_lea.hbm %s911_s3, %s521_s19  ;;  %s861_s22 = int_to_ptr.vmem [resolvable:$true] %s415_s22 }
  0x3d   : > { %512 = vmatprep.subr.msk.mxu1 %vm224_vm0, %v219_v5  ;;  %510 = vmatpush1.msk.msra.mxu0 %vm224_vm0, %v208_v2  ;;  %v383_v12 = vunpack.c.0.s8 %v382_v9  ;;  %s399_s30 = scalar_lea.sflag [#allocation4], %s840_s5  ;;  %s620_s4 = scalar_lea.vmem %s861_s22, 128 }
  0x3e   : > { %513 = vmatpush1.msk.msra.mxu1 %vm224_vm0, %v209_v3  ;;  %511 = vmatmul.mubr.msk.f32.vlgmr.msra.gmra.mrb[0].mxu0 %vm220_vm1, %v207_v7  ;;  %p621_p8 = scmp.ne.s32.totalorder %s861_s22, %s620_s4  ;;  %p920_p9 = scmp.ne.s32.totalorder %s915_s25, 0 }
  0x3f   : > { %514 = vmatmul.mubr.msk.f32.vlgmr.msra.gmra.mrb[0].mxu1 %vm220_vm1, %v207_v7  ;;  %v386_v21 = vsub.s32 %v383_v12, %v385_v13  ;;  %s708_s15 = smov [#allocation5]  }
  0x40   : > { %p622_p11 = pnand %p621_p8, %p920_p9  ;;  %s624_s7 = sshll.u32 %s708_s15, 4  ;;  %s625_s7 = int_to_ptr.vmem [resolvable:$false] %s624_s7 }
  0x41   : > { %s626_s11 = scalar_lea.vmem %s625_s7, 256  ;;  %p627_p7 = scmp.lt.s32.totalorder %s861_s22, %s625_s7 }
  0x42   : > { %p623_p0 = pneg %p622_p11  ;;  %p628_p13 = scmp.lt.s32.totalorder %s626_s11, %s620_s4 }
  0x44   : > { %p629_p3 = por %p628_p13, %p627_p7 }
  0x46   : > { %p630_p6 = pnand %p629_p3, %p623_p0 }
  0xbb   : > { %v214_v11 = vpop.permute.xlu0 %213 }
 0x111   : > { %v299_v14 = vpop.f32.mrb[0].mxu0 }
 0x112   : > { %v370_v15 = vpop.f32.mrb[0].mxu1  ;;  %v300_v16 = vadd.f32 %v299_v14, %v214_v11  ;;  %v301_v18 = vpop.f32.mrb[1].mxu0 }
 0x113   : > { %v371_v17 = vadd.f32 %v370_v15, %v214_v11  ;;  %v372_v19 = vpop.f32.mrb[1].mxu1  ;;  %v302_v20 = vadd.f32 %v301_v18, %v214_v11 }
 0x114   : > { %v373_v22 = vadd.f32 %v372_v19, %v214_v11 }
 0x115   : > { %v379_v23 = vcombine.low %v300_v16, %v302_v20 }
 0x116   : > { %v380_v24 = vcombine.low %v371_v17, %v373_v22 }
 0x117   : > { %v387_v25 = vrot.slane %v379_v23, %v386_v21 }
 0x118   : > { %v394_v26 = vrot.slane %v380_v24, %v386_v21 }
 0x11a   : > { %v395_v27 = vcombine.low %v387_v25, %v394_v26 }
 0x11c   : > { %397 = vst [vmem:[%s204_s21] sm:$0xff] %v395_v27 }
 0x11d   : > { %633 = shalt.err (!%p630_p6)
}
 0x11e   : > { %s634_s5 = scalar_lea.hbm %s859_s29, 128  ;;  %s638_s8 = scalar_lea.hbm %s911_s3, 256 }
 0x11f   : > { %p635_p4 = scmp.ne.s32.totalorder %s859_s29, %s634_s5  ;;  %p639_p1 = scmp.lt.u32.totalorder %s859_s29, %s911_s3 }
 0x120   : > { %p640_p2 = scmp.lt.u32.totalorder %s638_s8, %s634_s5  ;;  %p642_p8 = scmp.lt.u32.totalorder %s634_s5, %s859_s29 }
 0x121   : > { %p636_p10 = pnand %p635_p4, %p920_p9 }
 0x122   : > { %p641_p5 = por %p640_p2, %p639_p1 }
 0x123   : > { %p637_p12 = pneg %p636_p10 }
 0x124   : > { %p643_p11 = por %p642_p8, %p641_p5 }
 0x126   : > { %p644_p0 = pnand %p643_p11, %p637_p12 }
 0x128   : > { %647 = shalt.err (!%p644_p0)
}
 0x129   : > { %524 = dma.vmem_to_hbm [thread:$0]  (%p920_p9), %s861_s22, 128, %s859_s29, %s399_s30  }
 0x12a PF: > { %s427_s24 = sand.u32 1, %s682_s12   ;;  %p921_p7 = scmp.ne.s32.totalorder %s916_s27, 0 }
 0x12b   : > { %p922_p13 = scmp.ge.s32.totalorder %s702_s17, 2  ;;  %s428_s19 = scalar_lea.sflag [#allocation4], %s427_s24 }
 0x12d   : > { %p531_p3 = pnand %p922_p13, %p921_p7 }
 0x12f   : > { %677 = dma.done.wait (!%p531_p3), %s428_s19, 128  }
 0x130   : > { %679 = vsyncadd (!%p531_p3), %s428_s19, 4294967168  ;;  %s19_s17 = sadd.s32 1, %s702_s17   ;;  %s923_s12 = smov %s686_s13 }
 0x131   : > { %p16_p6 = scmp.ge.s32.totalorder %s19_s17, 4   ;;  %s924_s13 = smov %s690_s14 }
 0x132   : > { %s925_s14 = smov %s785_s26  ;;  %s926_s15 = smov %s698_s16 }
 0x133   : > { %s927_s16 = smov %s929_s20  ;;  %18 = sbr.rel (!%p16_p6) target bundleno = 6 (0x6), region = 77 }
 0x13a   :  { %433 = vsyncpa [#allocation3], 1 }
 0x13b   :  { %435 = vsyncpa [#allocation3 + $0x1], 1 }
 0x13c   :  { %436 = vsyncpa [#allocation4], 1 }
 0x13d   :  { %438 = vsyncpa [#allocation4 + $0x1], 1 }

</bundles_post_ra>
